<compile_context>
chip_gen: v7x
topology: tpu7x:2x2x1
jax: 0.10.0
libtpu: 0.0.40
codegen_flags: <defaults>
</compile_context>

<pallas_src>
import jax
import jax.numpy as jnp
from jax.experimental import pallas as pl
from jax.experimental.pallas import tpu as pltpu


def _round_up(x: int, m: int) -> int:
    return ((x + m - 1) // m) * m


def babygpt_kernel(x_ref, w_ref, b_ref, out_ref):
    # x_ref  : (tm, E)  bf16  gathered token embeddings (tile of tokens)
    # w_ref  : (E, tn)  bf16  lm_head weight slab (W^T layout)
    # b_ref  : (1, tn)  f32   bias slab
    # out_ref: (tm, tn) f32   logits tile
    logits = jnp.dot(x_ref[...], w_ref[...],
                     preferred_element_type=jnp.float32)        # (tm, tn) f32
    out_ref[...] = (logits + b_ref[...]).astype(out_ref.dtype)  # bias epilogue


def babygpt_forward(idx, emb_table, w, bias, *, tm=256):
    """Forward pass of BabyGPT (targets=None path).

    idx:       (B, T) integer token ids
    emb_table: (V, E) nn.Embedding weight
    w:         (V, E) nn.Linear weight (out_features=V, in_features=E)
    bias:      (V,)   nn.Linear bias
    Returns (logits (B, T, V) float32, None).
    """
    B, T = idx.shape
    V, E = emb_table.shape
    N = B * T

    LANE = 128
    Vp = _round_up(V, LANE)                  # lane-dense padded vocab
    Np = _round_up(N, tm)                    # token count padded to the tile

    # Largest lane-dense vocab tile that divides Vp (fewer, larger tiles).
    tn = LANE
    for cand in (2048, 1024, 512, 256, 128):
        if Vp % cand == 0:
            tn = cand
            break

    # Hoisted gather (XLA): (Np, E) bf16 token embeddings, padded rows -> row 0.
    idx_flat = jnp.zeros((Np,), jnp.int32).at[:N].set(
        idx.reshape(N).astype(jnp.int32))
    emb_bf = emb_table.astype(jnp.bfloat16)
    x = jnp.take(emb_bf, idx_flat, axis=0)            # (Np, E) bf16

    # nn.Linear computes x @ W.T + b; store W.T as (E, Vp), zero-padded lanes.
    w_t = jnp.zeros((E, Vp), jnp.bfloat16).at[:, :V].set(
        w.T.astype(jnp.bfloat16))
    b_p = jnp.zeros((1, Vp), jnp.float32).at[:, :V].set(
        bias.astype(jnp.float32).reshape(1, V))

    grid = (Np // tm, Vp // tn)

    # Double-buffered working set (inputs + output tile), with headroom.
    vmem_bytes = 2 * (tm * E * 2 + E * tn * 2 + tn * 4 + tm * tn * 4)
    vmem_limit = int(min(max(2 * vmem_bytes, 8 << 20), 100 << 20))

    cost = pl.CostEstimate(
        flops=2 * Np * Vp * E,
        transcendentals=0,
        bytes_accessed=Np * E * 2 + E * Vp * 2 + Vp * 4 + Np * Vp * 4,
    )

    logits_p = pl.pallas_call(
        babygpt_kernel,
        out_shape=jax.ShapeDtypeStruct((Np, Vp), jnp.float32),
        grid=grid,
        in_specs=[
            pl.BlockSpec((tm, E), lambda i, j: (i, 0)),   # gathered embeddings
            pl.BlockSpec((E, tn), lambda i, j: (0, j)),   # W^T slab
            pl.BlockSpec((1, tn), lambda i, j: (0, j)),   # bias slab
        ],
        out_specs=pl.BlockSpec((tm, tn), lambda i, j: (i, j)),
        compiler_params=pltpu.CompilerParams(
            dimension_semantics=("parallel", "parallel"),
            vmem_limit_bytes=vmem_limit),
        cost_estimate=cost,
    )(x, w_t, b_p)

    if Np == N and Vp == V:
        logits = logits_p.reshape(B, T, V)
    else:
        logits = logits_p[:N, :V].reshape(B, T, V)

    loss = None   # targets=None path of the PyTorch forward
    return logits, loss


if __name__ == "__main__":
    # Shapes implied by the module docstring: idx (32, 8), n_embd = 32;
    # char-level vocab of 65 (Shakespeare-style Tokenizer).
    B, T = 32, 8
    vocab_size, n_embd = 65, 32

    key = jax.random.PRNGKey(0)
    k_idx, k_emb, k_w, k_b = jax.random.split(key, 4)

    idx = jax.random.randint(k_idx, (B, T), 0, vocab_size, dtype=jnp.int32)
    emb_table = jax.random.normal(k_emb, (vocab_size, n_embd), jnp.float32) * 0.02
    # PyTorch nn.Linear weight layout: (out_features, in_features) = (V, E).
    w = jax.random.normal(k_w, (vocab_size, n_embd), jnp.float32) * 0.02
    bias = jax.random.normal(k_b, (vocab_size,), jnp.float32) * 0.02

    logits, loss = babygpt_forward(idx, emb_table, w, bias)
    jax.block_until_ready(logits)

    # Reference (params rounded to the same bf16 the kernel consumes).
    emb_bf = emb_table.astype(jnp.bfloat16).astype(jnp.float32)
    w_bf = w.astype(jnp.bfloat16).astype(jnp.float32)
    logits_ref = emb_bf[idx] @ w_bf.T + bias
    assert logits.shape == (B, T, vocab_size)
    assert loss is None
    assert jnp.allclose(logits, logits_ref, atol=1e-4, rtol=1e-4), \
        float(jnp.max(jnp.abs(logits - logits_ref)))

    # Second check exercising a multi-tile grid (2 token tiles x 3 vocab tiles).
    B2, T2, V2, E2 = 4, 64, 300, 32
    k_idx2, k_emb2, k_w2, k_b2 = jax.random.split(jax.random.PRNGKey(1), 4)
    idx2 = jax.random.randint(k_idx2, (B2, T2), 0, V2, dtype=jnp.int32)
    emb2 = jax.random.normal(k_emb2, (V2, E2), jnp.float32) * 0.02
    w2 = jax.random.normal(k_w2, (V2, E2), jnp.float32) * 0.02
    b2 = jax.random.normal(k_b2, (V2,), jnp.float32) * 0.02
    logits2, _ = babygpt_forward(idx2, emb2, w2, b2, tm=128)
    jax.block_until_ready(logits2)
    ref2 = (emb2.astype(jnp.bfloat16).astype(jnp.float32)[idx2]
            @ w2.astype(jnp.bfloat16).astype(jnp.float32).T + b2)
    assert jnp.allclose(logits2, ref2, atol=1e-4, rtol=1e-4), \
        float(jnp.max(jnp.abs(logits2 - ref2)))

    # TODO(synk): cross-entropy loss branch (targets != None) and generate()
    # sampling loop are not part of this kernel.
    print("KERNEL_OK")
</pallas_src>

<mosaic_0001>
module attributes {stable_mosaic.version = 11 : i64} {
  func.func @babygpt_kernel(%arg0: i32, %arg1: i32, %arg2: memref<256x32xbf16, #tpu.memory_space<vmem>>, %arg3: memref<32x128xbf16, #tpu.memory_space<vmem>>, %arg4: memref<1x128xf32, #tpu.memory_space<vmem>>, %arg5: memref<256x128xf32, #tpu.memory_space<vmem>>) attributes {dimension_semantics = [#tpu.dimension_semantics<parallel>, #tpu.dimension_semantics<parallel>], iteration_bounds = array<i64: 1, 1>, scalar_prefetch = 0 : i64, scratch_operands = 0 : i64, tpu.core_type = #tpu.core_type<tc>, window_params = [{transform_indices = @transform_0, window_bounds = array<i64: 256, 32>}, {transform_indices = @transform_1, window_bounds = array<i64: 32, 128>}, {transform_indices = @transform_2, window_bounds = array<i64: 1, 128>}, {transform_indices = @transform_3, window_bounds = array<i64: 256, 128>}]} {
    %c0 = arith.constant 0 : index
    %c0_0 = arith.constant 0 : index
    %0 = vector.load %arg2[%c0, %c0_0] : memref<256x32xbf16, #tpu.memory_space<vmem>>, vector<256x32xbf16>
    %c0_1 = arith.constant 0 : index
    %c0_2 = arith.constant 0 : index
    %1 = vector.load %arg3[%c0_1, %c0_2] : memref<32x128xbf16, #tpu.memory_space<vmem>>, vector<32x128xbf16>
    %cst = arith.constant dense<0.000000e+00> : vector<256x128xf32>
    %2 = tpu.matmul %0, %1, %cst {dimension_numbers = #tpu.dot_dimension_numbers<[1], [0], [0], [1], [0, 0, 1, 1], [], []>} : vector<256x32xbf16>, vector<32x128xbf16>, vector<256x128xf32> -> vector<256x128xf32>
    %c0_3 = arith.constant 0 : index
    %c0_4 = arith.constant 0 : index
    %3 = vector.load %arg4[%c0_3, %c0_4] : memref<1x128xf32, #tpu.memory_space<vmem>>, vector<1x128xf32>
    %4 = vector.broadcast %3 : vector<1x128xf32> to vector<256x128xf32>
    %5 = arith.addf %2, %4 : vector<256x128xf32>
    %c0_5 = arith.constant 0 : index
    %c0_6 = arith.constant 0 : index
    %6 = vector.load %arg5[%c0_5, %c0_6] : memref<256x128xf32, #tpu.memory_space<vmem>>, vector<256x128xf32>
    tpu.vector_store %arg5[%c0_5, %c0_6], %5 {strides = array<i32>} : memref<256x128xf32, #tpu.memory_space<vmem>>, vector<256x128xf32>,
    return
  }
  func.func @transform_0(%arg0: i32, %arg1: i32) -> (i32, i32) {
    %c0_i32 = arith.constant 0 : i32
    %c0_i32_0 = arith.constant 0 : i32
    return %arg0, %c0_i32 : i32, i32
  }
  func.func @transform_1(%arg0: i32, %arg1: i32) -> (i32, i32) {
    %c0_i32 = arith.constant 0 : i32
    %c0_i32_0 = arith.constant 0 : i32
    return %c0_i32, %arg1 : i32, i32
  }
  func.func @transform_2(%arg0: i32, %arg1: i32) -> (i32, i32) {
    %c0_i32 = arith.constant 0 : i32
    %c0_i32_0 = arith.constant 0 : i32
    return %c0_i32, %arg1 : i32, i32
  }
  func.func @transform_3(%arg0: i32, %arg1: i32) -> (i32, i32) {
    %c0_i32 = arith.constant 0 : i32
    return %arg0, %arg1 : i32, i32
  }
}

</mosaic_0001>

<bundles_post_ra>
// kernel: tpu_custom_call.1
= control target key start
LH: loop header
LB: loop body
LE: loop exit
PB: predicated region body
PF: predicated region fallthrough
CT: control target
= control target key end

     0   :  { %vm151_vm0 = vcmask 261120   ;;  %s689_s0 = inlined_call_operand.vmem [shape: bf16[256,32], index: 0, kind: input, shape index: {}]   ;;  %s690_s1 = inlined_call_operand.vmem [shape: bf16[32,128], index: 1, kind: input, shape index: {}]   ;;  %s691_s2 = inlined_call_operand.vmem [shape: f32[1,128], index: 2, kind: input, shape index: {}]   ;;  %s692_s3 = inlined_call_operand.hbm [shape: f32[256,128], index: 3, kind: output, shape index: {}]  }
   0x1   :  { %v505_v0 = vld [vmem:[%s690_s1] sm:$0xff]   ;;  %v506_v1 = vld [vmem:[%s690_s1 + $0x8] sm:$0xff]   ;;  %v511_v6 = vld [vmem:[%s689_s0 + $0x10] sm:$0xff]  }
   0x2   :  { %462 = vmatprep.subr.bf16.mxu0 %v505_v0  ;;  %498 = vmatprep.subr.bf16.mxu1 %v505_v0  ;;  %v507_v2 = vld [vmem:[%s689_s0] sm:$0xff]   ;;  %v509_v4 = vld [vmem:[%s689_s0 + $0x8] sm:$0xff]   ;;  %v512_v7 = vld [vmem:[%s689_s0 + $0x50] sm:$0xff]  }
   0x3   :  { %463 = vmatpush3.bf16.msra.mxu0 %v505_v0  ;;  %500 = vmatpush3.bf16.msra.mxu1 %v505_v0  ;;  %v508_v3 = vld [vmem:[%s689_s0 + $0x40] sm:$0xff]   ;;  %v510_v5 = vld [vmem:[%s689_s0 + $0x48] sm:$0xff]   ;;  %v513_v8 = vld [vmem:[%s689_s0 + $0x18] sm:$0xff]  }
   0x4   :  { %464 = vmatprep.subr.bf16.mxu0 %v506_v1  ;;  %499 = vmatprep.subr.bf16.mxu1 %v506_v1  ;;  %v514_v9 = vld [vmem:[%s689_s0 + $0x58] sm:$0xff]   ;;  %v515_v10 = vld [vmem:[%s689_s0 + $0x20] sm:$0xff]  }
   0x5   :  { %466 = vmatprep.mubr.msk.bf16.mxu0 %vm151_vm0, %v507_v2  ;;  %482 = vmatprep.mubr.msk.bf16.mxu1 %vm151_vm0, %v508_v3  ;;  %v516_v11 = vld [vmem:[%s689_s0 + $0x60] sm:$0xff]  }
   0x7   :  { %465 = vmatpush3.bf16.msra.mxu0 %v506_v1  ;;  %501 = vmatpush3.bf16.msra.mxu1 %v506_v1 }
   0xa   :  { %467 = vmatmul.mubr.msk.bf16.vlgmr.msra.gmra.mrb[0].mxu0 %vm151_vm0, %v509_v4  ;;  %483 = vmatmul.mubr.msk.bf16.vlgmr.msra.gmra.mrb[0].mxu1 %vm151_vm0, %v510_v5 }
   0xb   :  { %470 = vmatprep.mubr.msk.bf16.mxu0 %vm151_vm0, %v511_v6  ;;  %486 = vmatprep.mubr.msk.bf16.mxu1 %vm151_vm0, %v512_v7 }
  0x12   :  { %471 = vmatmul.mubr.msk.bf16.gmra.mrb[4].mxu0 %vm151_vm0, %v513_v8  ;;  %487 = vmatmul.mubr.msk.bf16.gmra.mrb[4].mxu1 %vm151_vm0, %v514_v9 }
  0x13   :  { %8 = vsyncpa [#allocation3], 0  ;;  %474 = vmatprep.mubr.msk.bf16.mxu0 %vm151_vm0, %v515_v10  ;;  %490 = vmatprep.mubr.msk.bf16.mxu1 %vm151_vm0, %v516_v11  ;;  %v517_v12 = vld [vmem:[%s689_s0 + $0x28] sm:$0xff]   ;;  %v519_v14 = vld [vmem:[%s689_s0 + $0x30] sm:$0xff]  }
  0x14   :  { %v518_v13 = vld [vmem:[%s689_s0 + $0x68] sm:$0xff]   ;;  %v520_v15 = vld [vmem:[%s689_s0 + $0x70] sm:$0xff]   ;;  %v521_v16 = vld [vmem:[%s689_s0 + $0x38] sm:$0xff]  }
  0x15   :  { %v522_v17 = vld [vmem:[%s689_s0 + $0x78] sm:$0xff]   ;;  %v643_v18 = vld [vmem:[%s691_s2] ss:$0 sm:$0xff]  ;;  %s547_s0 = smov [#allocation2]  }
  0x16   :  { %s398_s2 = sshll.u32 %s547_s0, 4  ;;  %s399_s2 = int_to_ptr.vmem [resolvable:$true] %s398_s2 }
  0x17   :  { %s523_s1 = scalar_lea.vmem %s399_s2, 4096  ;;  %p528_p1 = scmp.lt.s32.totalorder %s399_s2, %s399_s2 }
  0x18   :  { %p524_p0 = scmp.ne.s32.totalorder %s399_s2, %s523_s1  ;;  %p529_p2 = scmp.lt.s32.totalorder %s523_s1, %s523_s1 }
  0x1a   :  { %475 = vmatmul.mubr.msk.bf16.gmra.mrb[8].mxu0 %vm151_vm0, %v517_v12  ;;  %491 = vmatmul.mubr.msk.bf16.gmra.mrb[8].mxu1 %vm151_vm0, %v518_v13  ;;  %p530_p3 = por %p529_p2, %p528_p1 }
  0x1b   :  { %478 = vmatprep.mubr.msk.bf16.mxu0 %vm151_vm0, %v519_v14  ;;  %494 = vmatprep.mubr.msk.bf16.mxu1 %vm151_vm0, %v520_v15 }
  0x1c   :  { %p531_p4 = pnand %p530_p3, %p524_p0 }
  0x22   :  { %479 = vmatmul.mubr.msk.bf16.gmra.mrb[12].mxu0 %vm151_vm0, %v521_v16  ;;  %495 = vmatmul.mubr.msk.bf16.gmra.mrb[12].mxu1 %vm151_vm0, %v522_v17 }
  0xdd   :  { %v468_v19 = vpop.f32.mrb[0].mxu0  ;;  %v484_v20 = vpop.f32.mrb[0].mxu1 }
  0xde   :  { %v243_v21 = vadd.f32 %v468_v19, %v643_v18  ;;  %v307_v22 = vadd.f32 %v484_v20, %v643_v18  ;;  %v234_v23 = vpop.f32.mrb[1].mxu0  ;;  %v298_v24 = vpop.f32.mrb[1].mxu1 }
  0xdf   :  { %v235_v25 = vadd.f32 %v643_v18, %v234_v23  ;;  %v299_v26 = vadd.f32 %v643_v18, %v298_v24  ;;  %v469_v27 = vpop.f32.mrb[2].mxu0  ;;  %v485_v28 = vpop.f32.mrb[2].mxu1 }
  0xe0   :  { %363 = vst [vmem:[#allocation2 + $0x10] sm:$0xff] %v243_v21  ;;  %379 = vst [vmem:[#allocation2 + $0x90] sm:$0xff] %v307_v22  ;;  %v246_v29 = vadd.f32 %v469_v27, %v643_v18  ;;  %v310_v30 = vadd.f32 %v485_v28, %v643_v18  ;;  %v237_v31 = vpop.f32.mrb[3].mxu0  ;;  %v301_v32 = vpop.f32.mrb[3].mxu1 }
  0xe1   :  { %361 = vst [vmem:[#allocation2] sm:$0xff] %v235_v25  ;;  %377 = vst [vmem:[#allocation2 + $0x80] sm:$0xff] %v299_v26  ;;  %v238_v33 = vadd.f32 %v643_v18, %v237_v31  ;;  %v302_v34 = vadd.f32 %v643_v18, %v301_v32 }
  0xe2   :  { %364 = vst [vmem:[#allocation2 + $0x18] sm:$0xff] %v246_v29  ;;  %380 = vst [vmem:[#allocation2 + $0x98] sm:$0xff] %v310_v30 }
  0xe3   :  { %362 = vst [vmem:[#allocation2 + $0x8] sm:$0xff] %v238_v33  ;;  %378 = vst [vmem:[#allocation2 + $0x88] sm:$0xff] %v302_v34 }
  0xe5   :  { %v472_v35 = vpop.f32.mrb[4].mxu0  ;;  %v488_v36 = vpop.f32.mrb[4].mxu1 }
  0xe6   :  { %v259_v37 = vadd.f32 %v472_v35, %v643_v18  ;;  %v323_v38 = vadd.f32 %v488_v36, %v643_v18  ;;  %v250_v39 = vpop.f32.mrb[5].mxu0  ;;  %v314_v40 = vpop.f32.mrb[5].mxu1 }
  0xe7   :  { %v251_v41 = vadd.f32 %v643_v18, %v250_v39  ;;  %v315_v42 = vadd.f32 %v643_v18, %v314_v40  ;;  %v473_v43 = vpop.f32.mrb[6].mxu0  ;;  %v489_v44 = vpop.f32.mrb[6].mxu1 }
  0xe8   :  { %367 = vst [vmem:[#allocation2 + $0x30] sm:$0xff] %v259_v37  ;;  %383 = vst [vmem:[#allocation2 + $0xb0] sm:$0xff] %v323_v38  ;;  %v262_v45 = vadd.f32 %v473_v43, %v643_v18  ;;  %v326_v46 = vadd.f32 %v489_v44, %v643_v18  ;;  %v253_v47 = vpop.f32.mrb[7].mxu0  ;;  %v317_v48 = vpop.f32.mrb[7].mxu1 }
  0xe9   :  { %365 = vst [vmem:[#allocation2 + $0x20] sm:$0xff] %v251_v41  ;;  %381 = vst [vmem:[#allocation2 + $0xa0] sm:$0xff] %v315_v42  ;;  %v254_v49 = vadd.f32 %v643_v18, %v253_v47  ;;  %v318_v50 = vadd.f32 %v643_v18, %v317_v48 }
  0xea   :  { %368 = vst [vmem:[#allocation2 + $0x38] sm:$0xff] %v262_v45  ;;  %384 = vst [vmem:[#allocation2 + $0xb8] sm:$0xff] %v326_v46 }
  0xeb   :  { %366 = vst [vmem:[#allocation2 + $0x28] sm:$0xff] %v254_v49  ;;  %382 = vst [vmem:[#allocation2 + $0xa8] sm:$0xff] %v318_v50 }
  0xed   :  { %v476_v51 = vpop.f32.mrb[8].mxu0  ;;  %v492_v52 = vpop.f32.mrb[8].mxu1 }
  0xee   :  { %v275_v53 = vadd.f32 %v476_v51, %v643_v18  ;;  %v339_v54 = vadd.f32 %v492_v52, %v643_v18  ;;  %v266_v55 = vpop.f32.mrb[9].mxu0  ;;  %v330_v56 = vpop.f32.mrb[9].mxu1 }
  0xef   :  { %v267_v57 = vadd.f32 %v643_v18, %v266_v55  ;;  %v331_v58 = vadd.f32 %v643_v18, %v330_v56  ;;  %v477_v59 = vpop.f32.mrb[10].mxu0  ;;  %v493_v60 = vpop.f32.mrb[10].mxu1 }
  0xf0   :  { %371 = vst [vmem:[#allocation2 + $0x50] sm:$0xff] %v275_v53  ;;  %387 = vst [vmem:[#allocation2 + $0xd0] sm:$0xff] %v339_v54  ;;  %v278_v61 = vadd.f32 %v477_v59, %v643_v18  ;;  %v342_v62 = vadd.f32 %v493_v60, %v643_v18  ;;  %v269_v63 = vpop.f32.mrb[11].mxu0  ;;  %v333_v0 = vpop.f32.mrb[11].mxu1 }
  0xf1   :  { %369 = vst [vmem:[#allocation2 + $0x40] sm:$0xff] %v267_v57  ;;  %385 = vst [vmem:[#allocation2 + $0xc0] sm:$0xff] %v331_v58  ;;  %v270_v1 = vadd.f32 %v643_v18, %v269_v63  ;;  %v334_v2 = vadd.f32 %v643_v18, %v333_v0 }
  0xf2   :  { %372 = vst [vmem:[#allocation2 + $0x58] sm:$0xff] %v278_v61  ;;  %388 = vst [vmem:[#allocation2 + $0xd8] sm:$0xff] %v342_v62 }
  0xf3   :  { %370 = vst [vmem:[#allocation2 + $0x48] sm:$0xff] %v270_v1  ;;  %386 = vst [vmem:[#allocation2 + $0xc8] sm:$0xff] %v334_v2 }
  0xf5   :  { %v480_v3 = vpop.f32.mrb[12].mxu0  ;;  %v496_v4 = vpop.f32.mrb[12].mxu1 }
  0xf6   :  { %v291_v5 = vadd.f32 %v480_v3, %v643_v18  ;;  %v355_v6 = vadd.f32 %v496_v4, %v643_v18  ;;  %v282_v7 = vpop.f32.mrb[13].mxu0  ;;  %v346_v8 = vpop.f32.mrb[13].mxu1 }
  0xf7   :  { %v283_v9 = vadd.f32 %v643_v18, %v282_v7  ;;  %v347_v10 = vadd.f32 %v643_v18, %v346_v8  ;;  %v481_v11 = vpop.f32.mrb[14].mxu0  ;;  %v497_v12 = vpop.f32.mrb[14].mxu1 }
  0xf8   :  { %375 = vst [vmem:[#allocation2 + $0x70] sm:$0xff] %v291_v5  ;;  %391 = vst [vmem:[#allocation2 + $0xf0] sm:$0xff] %v355_v6  ;;  %v294_v13 = vadd.f32 %v481_v11, %v643_v18  ;;  %v358_v14 = vadd.f32 %v497_v12, %v643_v18  ;;  %v285_v15 = vpop.f32.mrb[15].mxu0  ;;  %v349_v16 = vpop.f32.mrb[15].mxu1 }
  0xf9   :  { %373 = vst [vmem:[#allocation2 + $0x60] sm:$0xff] %v283_v9  ;;  %389 = vst [vmem:[#allocation2 + $0xe0] sm:$0xff] %v347_v10  ;;  %v286_v17 = vadd.f32 %v643_v18, %v285_v15  ;;  %v350_v19 = vadd.f32 %v643_v18, %v349_v16 }
  0xfa   :  { %376 = vst [vmem:[#allocation2 + $0x78] sm:$0xff] %v294_v13  ;;  %392 = vst [vmem:[#allocation2 + $0xf8] sm:$0xff] %v358_v14 }
  0xfb   :  { %374 = vst [vmem:[#allocation2 + $0x68] sm:$0xff] %v286_v17  ;;  %390 = vst [vmem:[#allocation2 + $0xe8] sm:$0xff] %v350_v19 }
  0xfc   :  { %534 = shalt.err (!%p531_p4)
}
  0xfd   :  { %s535_s24 = scalar_lea.hbm %s692_s3, 4096 }
  0xfe   :  { %p536_p5 = scmp.ne.s32.totalorder %s692_s3, %s535_s24  ;;  %p539_p6 = scmp.lt.u32.totalorder %s535_s24, %s692_s3 }
 0x100   :  { %p541_p7 = pnand %p539_p6, %p536_p5 }
 0x102   :  { %544 = shalt.err (!%p541_p7)
}
 0x103   :  { %s548_s29 = smov 128   ;;  %s549_s30 = smov 8  }
 0x104   :  { %404 = dma.vmem_to_hbm [thread:$0]  %s399_s2, 4096, %s692_s3, [#allocation3], %s548_s29, %s548_s29, %s549_s30  }
 0x105   :  { %545 = dma.done.wait [#allocation3], 4096  }
 0x106   :  { %546 = vsyncadd [#allocation3], 4294963200 }
 0x107   :  { %408 = vsyncpa [#allocation3], 1 }

</bundles_post_ra>
